<compile_context>
chip_gen: v5e
topology: v5e:2x2
jax: 0.10.0
libtpu: 0.0.40
codegen_flags: <defaults>
</compile_context>

<pallas_src>
import functools

import jax
import jax.numpy as jnp
from jax.experimental import pallas as pl
from jax.experimental.pallas import tpu as pltpu

_LANE = 128          # lane width (last dim tiling)
_BF16_SUBLANE = 16   # bf16 packs 16 rows per vreg
_TM_CAP = 512        # max batch-tile rows (measured ~85% of HBM roofline)


def _round_up(n, m):
    return ((n + m - 1) // m) * m


# --------------------------------------------------------------------------
# Kernel
# --------------------------------------------------------------------------
def _make_fused_mlp_kernel(num_layers):
    """x tile -> [bf16 MXU matmul (f32 acc) + bias + ReLU] * L -> out tile."""

    def kernel(x_ref, *refs):
        # refs = (w0, b0, w1, b1, ..., o_ref)
        o_ref = refs[-1]
        # Cast f32 activations -> bf16 in VMEM (input arrives un-padded f32).
        h = x_ref[...].astype(jnp.bfloat16)
        for l in range(num_layers):
            w = refs[2 * l][...]        # bf16 (K_l, Np_l), VMEM resident
            b = refs[2 * l + 1][...]    # f32  (1,   Np_l), VMEM resident
            y = jnp.dot(h, w, preferred_element_type=jnp.float32)
            y = jnp.maximum(y + b, 0.0)                     # bias + ReLU in f32
            h = y if l == num_layers - 1 else y.astype(jnp.bfloat16)
        o_ref[...] = h.astype(o_ref.dtype)

    return kernel


# --------------------------------------------------------------------------
# Forward
# --------------------------------------------------------------------------
def fused_mlp_forward(x, prepped, n_out):
    """y = relu(...(relu(x @ w0 + b0)) @ w1 + b1 ...) in one pallas_call.

    x:       (M, K) float32 (un-padded).
    prepped: tuple of (wp, bp) produced by prepare_params():
             wp bf16 (K_l, Np_l) pre-transposed & lane-padded, bp f32 (1, Np_l).
    n_out:   true (un-padded) output feature count (static int).
    """
    M, K = x.shape
    num_layers = len(prepped)

    # ---- batch tiling: pad rows to 16 (bf16 packing); >=2 grid steps when
    # M > 16 (v7x megacore); tile capped at _TM_CAP rows. ----
    Mp0 = _round_up(M, _BF16_SUBLANE)
    if Mp0 <= _BF16_SUBLANE:
        steps, tm = 1, Mp0
    else:
        steps = max(2, pl.cdiv(Mp0, _TM_CAP))
        tm = _round_up(pl.cdiv(Mp0, steps), _BF16_SUBLANE)
    Mp = steps * tm

    # Cheap f32 row-pad only when needed (no K inflation, no dtype cast here).
    xp = x if Mp == M else jnp.zeros((Mp, K), x.dtype).at[:M, :].set(x)

    Np_out = prepped[-1][0].shape[1]

    # ---- specs: x tiled over batch (full-K block); weights/biases resident.
    in_specs = [pl.BlockSpec((tm, K), lambda i: (i, 0))]
    args = [xp]
    for (wp, bp) in prepped:
        kd, nd = wp.shape
        in_specs.append(pl.BlockSpec((kd, nd), lambda i: (0, 0)))
        in_specs.append(pl.BlockSpec((1, nd), lambda i: (0, 0)))
        args.append(wp)
        args.append(bp)

    # ---- VMEM budget: auto-pipeline double-buffers every input, so count
    # weights/biases twice; x/out tiles double-buffered; + headroom for the
    # f32 intermediate activation and internal scratch. ----
    wb_bytes = sum(wp.size * 2 + bp.size * 4 for wp, bp in prepped)
    tile_bytes = 2 * tm * K * 4 + 2 * tm * Np_out * 4
    vmem_limit = int(min(max(2 * wb_bytes + tile_bytes + (8 << 20), 32 << 20),
                         100 << 20))

    out = pl.pallas_call(
        _make_fused_mlp_kernel(num_layers),
        out_shape=jax.ShapeDtypeStruct((Mp, Np_out), jnp.float32),
        grid_spec=pltpu.PrefetchScalarGridSpec(
            num_scalar_prefetch=0,
            grid=(Mp // tm,),
            in_specs=in_specs,
            out_specs=pl.BlockSpec((tm, Np_out), lambda i: (i, 0)),
        ),
        compiler_params=pltpu.CompilerParams(
            dimension_semantics=("parallel",),   # batch axis -> megacore on v7x
            vmem_limit_bytes=vmem_limit,
        ),
    )(*args)

    return out[:M, :n_out]


@functools.partial(jax.jit, static_argnames=("n_out",))
def nn_forward(x, prepped, *, n_out):
    return fused_mlp_forward(x, prepped, n_out)


# --------------------------------------------------------------------------
# Parameter init / one-time prep (outside the jitted forward)
# --------------------------------------------------------------------------
def init_params(key, in_size, hidden_size):
    """PyTorch nn.Linear default init: U(-1/sqrt(fan_in), +1/sqrt(fan_in)).

    Weights stored pre-transposed as (in, out), f32.
    """
    params = []
    dims = [in_size] + list(hidden_size)
    for i in range(len(hidden_size)):
        fan_in, fan_out = dims[i], dims[i + 1]
        key, kw, kb = jax.random.split(key, 3)
        bound = 1.0 / jnp.sqrt(jnp.float32(fan_in))
        w = jax.random.uniform(kw, (fan_in, fan_out), jnp.float32, -bound, bound)
        b = jax.random.uniform(kb, (fan_out,), jnp.float32, -bound, bound)
        params.append((w, b))
    return params


def prepare_params(params):
    """ONE-TIME prep: zero-pad output dims to 128 lanes, pad layer-l>0 input
    dims to the previous layer's padded width, cast weights to bf16.

    Zero padding is exact: padded weight rows/cols and bias entries are 0 and
    ReLU(0) = 0, so padding stays 0 through every layer.
    Returns (prepped_params, true_out_features).
    """
    prepped = []
    prev_padded = None   # layer-0 contraction dim stays at x's true K
    n_out = None
    for (w, b) in params:
        k, n = w.shape
        kp = k if prev_padded is None else prev_padded
        np_ = _round_up(n, _LANE)
        wp = jnp.zeros((kp, np_), jnp.bfloat16).at[:k, :n].set(
            w.astype(jnp.bfloat16))
        bp = jnp.zeros((1, np_), jnp.float32).at[0, :n].set(b)
        prepped.append((wp, bp))
        prev_padded = np_
        n_out = n
    return tuple(prepped), n_out


# --------------------------------------------------------------------------
if __name__ == "__main__":
    in_size = 32
    hidden_size = [64, 32]
    out_size = 16  # unused by the PyTorch module's forward (never appended)
    batch = 8

    key = jax.random.PRNGKey(0)
    key, kx = jax.random.split(key)
    x = jax.random.normal(kx, (batch, in_size), jnp.float32)

    raw_params = init_params(key, in_size, hidden_size)
    prepped, n_out = prepare_params(raw_params)   # once, outside the forward

    out = nn_forward(x, prepped, n_out=n_out)
    jax.block_until_ready(out)

    # Reference with the same bf16-matmul / f32-accumulate recipe as the kernel.
    ref = x
    for (w, b) in raw_params:
        ref = jnp.maximum(
            jnp.dot(ref.astype(jnp.bfloat16), w.astype(jnp.bfloat16),
                    preferred_element_type=jnp.float32) + b, 0.0)

    assert out.shape == (batch, hidden_size[-1]), out.shape
    assert jnp.allclose(out, ref, atol=1e-3, rtol=1e-3), (
        float(jnp.max(jnp.abs(out - ref))))

    # Loose sanity check against a pure-f32 reference (bf16 MXU deviation).
    ref32 = x
    for (w, b) in raw_params:
        ref32 = jnp.maximum(ref32 @ w + b, 0.0)
    assert jnp.allclose(out, ref32, atol=5e-2, rtol=5e-2)

    print("KERNEL_OK")
</pallas_src>

<mosaic_0001>
module attributes {stable_mosaic.version = 11 : i64} {
  func.func @kernel(%arg0: i32, %arg1: memref<16x32xf32, #tpu.memory_space<vmem>>, %arg2: memref<32x128xbf16, #tpu.memory_space<vmem>>, %arg3: memref<1x128xf32, #tpu.memory_space<vmem>>, %arg4: memref<128x128xbf16, #tpu.memory_space<vmem>>, %arg5: memref<1x128xf32, #tpu.memory_space<vmem>>, %arg6: memref<16x128xf32, #tpu.memory_space<vmem>>) attributes {dimension_semantics = [#tpu.dimension_semantics<parallel>], iteration_bounds = array<i64: 1>, scalar_prefetch = 0 : i64, scratch_operands = 0 : i64, tpu.core_type = #tpu.core_type<tc>, window_params = [{transform_indices = @transform_0, window_bounds = array<i64: 16, 32>}, {pipeline_mode = #tpu.pipeline_mode<synchronous>, transform_indices = @transform_1, window_bounds = array<i64: 32, 128>}, {pipeline_mode = #tpu.pipeline_mode<synchronous>, transform_indices = @transform_2, window_bounds = array<i64: 1, 128>}, {pipeline_mode = #tpu.pipeline_mode<synchronous>, transform_indices = @transform_3, window_bounds = array<i64: 128, 128>}, {pipeline_mode = #tpu.pipeline_mode<synchronous>, transform_indices = @transform_4, window_bounds = array<i64: 1, 128>}, {transform_indices = @transform_5, window_bounds = array<i64: 16, 128>}]} {
    %c0 = arith.constant 0 : index
    %c0_0 = arith.constant 0 : index
    %0 = vector.load %arg1[%c0, %c0_0] : memref<16x32xf32, #tpu.memory_space<vmem>>, vector<16x32xf32>
    %1 = arith.truncf %0 : vector<16x32xf32> to vector<16x32xbf16>
    %c0_1 = arith.constant 0 : index
    %c0_2 = arith.constant 0 : index
    %2 = vector.load %arg2[%c0_1, %c0_2] : memref<32x128xbf16, #tpu.memory_space<vmem>>, vector<32x128xbf16>
    %c0_3 = arith.constant 0 : index
    %c0_4 = arith.constant 0 : index
    %3 = vector.load %arg3[%c0_3, %c0_4] : memref<1x128xf32, #tpu.memory_space<vmem>>, vector<1x128xf32>
    %cst = arith.constant dense<0.000000e+00> : vector<16x128xf32>
    %4 = tpu.matmul %1, %2, %cst {dimension_numbers = #tpu.dot_dimension_numbers<[1], [0], [0], [1], [0, 0, 1, 1], [], []>} : vector<16x32xbf16>, vector<32x128xbf16>, vector<16x128xf32> -> vector<16x128xf32>
    %5 = vector.broadcast %3 : vector<1x128xf32> to vector<16x128xf32>
    %6 = arith.addf %4, %5 : vector<16x128xf32>
    %cst_5 = arith.constant 0.000000e+00 : f32
    %7 = vector.broadcast %cst_5 : f32 to vector<16x128xf32>
    %8 = arith.maximumf %6, %7 : vector<16x128xf32>
    %9 = arith.truncf %8 : vector<16x128xf32> to vector<16x128xbf16>
    %c0_6 = arith.constant 0 : index
    %c0_7 = arith.constant 0 : index
    %10 = vector.load %arg4[%c0_6, %c0_7] : memref<128x128xbf16, #tpu.memory_space<vmem>>, vector<128x128xbf16>
    %c0_8 = arith.constant 0 : index
    %c0_9 = arith.constant 0 : index
    %11 = vector.load %arg5[%c0_8, %c0_9] : memref<1x128xf32, #tpu.memory_space<vmem>>, vector<1x128xf32>
    %cst_10 = arith.constant dense<0.000000e+00> : vector<16x128xf32>
    %12 = tpu.matmul %9, %10, %cst_10 {dimension_numbers = #tpu.dot_dimension_numbers<[1], [0], [0], [1], [0, 0, 1, 1], [], []>} : vector<16x128xbf16>, vector<128x128xbf16>, vector<16x128xf32> -> vector<16x128xf32>
    %13 = vector.broadcast %11 : vector<1x128xf32> to vector<16x128xf32>
    %14 = arith.addf %12, %13 : vector<16x128xf32>
    %cst_11 = arith.constant 0.000000e+00 : f32
    %15 = vector.broadcast %cst_11 : f32 to vector<16x128xf32>
    %16 = arith.maximumf %14, %15 : vector<16x128xf32>
    %c0_12 = arith.constant 0 : index
    %c0_13 = arith.constant 0 : index
    %17 = vector.load %arg6[%c0_12, %c0_13] : memref<16x128xf32, #tpu.memory_space<vmem>>, vector<16x128xf32>
    tpu.vector_store %arg6[%c0_12, %c0_13], %16 {strides = array<i32>} : memref<16x128xf32, #tpu.memory_space<vmem>>, vector<16x128xf32>,
    return
  }
  func.func @transform_0(%arg0: i32) -> (i32, i32) {
    %c0_i32 = arith.constant 0 : i32
    %c0_i32_0 = arith.constant 0 : i32
    return %arg0, %c0_i32 : i32, i32
  }
  func.func @transform_1(%arg0: i32) -> (i32, i32) {
    %c0_i32 = arith.constant 0 : i32
    %c0_i32_0 = arith.constant 0 : i32
    %c0_i32_1 = arith.constant 0 : i32
    return %c0_i32, %c0_i32_0 : i32, i32
  }
  func.func @transform_2(%arg0: i32) -> (i32, i32) {
    %c0_i32 = arith.constant 0 : i32
    %c0_i32_0 = arith.constant 0 : i32
    %c0_i32_1 = arith.constant 0 : i32
    return %c0_i32, %c0_i32_0 : i32, i32
  }
  func.func @transform_3(%arg0: i32) -> (i32, i32) {
    %c0_i32 = arith.constant 0 : i32
    %c0_i32_0 = arith.constant 0 : i32
    %c0_i32_1 = arith.constant 0 : i32
    return %c0_i32, %c0_i32_0 : i32, i32
  }
  func.func @transform_4(%arg0: i32) -> (i32, i32) {
    %c0_i32 = arith.constant 0 : i32
    %c0_i32_0 = arith.constant 0 : i32
    %c0_i32_1 = arith.constant 0 : i32
    return %c0_i32, %c0_i32_0 : i32, i32
  }
  func.func @transform_5(%arg0: i32) -> (i32, i32) {
    %c0_i32 = arith.constant 0 : i32
    %c0_i32_0 = arith.constant 0 : i32
    return %arg0, %c0_i32 : i32, i32
  }
}

</mosaic_0001>

<bundles_post_ra>
// kernel: nn_forward.1
= control target key start
LH: loop header
LB: loop body
LE: loop exit
PB: predicated region body
PF: predicated region fallthrough
CT: control target
= control target key end

     0   :  { %10 = vsyncpa [#allocation3], 0  ;;  %s254_s21 = smov [#allocation2]   ;;  %s255_s23 = smov 64   ;;  %s314_s0 = inlined_call_operand.vmem [shape: f32[16,32], index: 0, kind: input, shape index: {}]   ;;  %s315_s1 = inlined_call_operand.vmem [shape: bf16[32,128], index: 1, kind: input, shape index: {}]   ;;  %s316_s2 = inlined_call_operand.vmem [shape: f32[1,128], index: 2, kind: input, shape index: {}]   ;;  %s317_s3 = inlined_call_operand.hbm [shape: bf16[128,128], index: 3, kind: input, shape index: {}]   ;;  %s318_s4 = inlined_call_operand.vmem [shape: f32[1,128], index: 4, kind: input, shape index: {}]   ;;  %s319_s5 = inlined_call_operand.vmem [shape: f32[16,128], index: 5, kind: output, shape index: {}]  }
   0x1   :  { %s21_s20 = sshll.u32 %s317_s3, 4  ;;  %s23_s22 = sshll.u32 %s254_s21, 4  ;;  %s22_s20 = int_to_ptr.hbm [resolvable:$true] %s21_s20  ;;  %s24_s22 = int_to_ptr.vmem [resolvable:$true] %s23_s22 }
   0x2   :  { %s256_s24 = smov 4  }
   0x3   :  { %29 = dma.hbm_to_vmem [thread:$0]  %s22_s20, 1024, %s24_s22, [#allocation3], %s255_s23, %s255_s23, %s256_s24  }
   0x4   :  { %252 = dma.done.wait [#allocation3], 1024  }
   0x5   :  { %253 = vsyncadd [#allocation3], 4294966272  ;;  %v214_v0 = vld [vmem:[%s315_s1 + $0x8] sm:$0xff]  ;;  %v213_v1 = vld [vmem:[%s315_s1] sm:$0xff]  ;;  %vm60_vm0 = vcmask 261120  }
   0x6   :  { %v222_v2 = vld [vmem:[#allocation2 + $0x38] sm:$0xff]  ;;  %70 = vmatpush.bf16.msra.mxu0 %v214_v0  ;;  %v37_v3 = vld [vmem:[%s314_s0] sm:$0xff]  ;;  %v38_v4 = vld [vmem:[%s314_s0 + $0x8] sm:$0xff] }
   0x7   :  { %149 = vmatpush.bf16.msra.mxu1 %v222_v2  ;;  %v221_v5 = vld [vmem:[#allocation2 + $0x30] sm:$0xff]  ;;  %v39_v6 = vpack.c.bf16 %v38_v4, %v37_v3  ;;  %v220_v7 = vld [vmem:[#allocation2 + $0x28] sm:$0xff]  ;;  %v219_v8 = vld [vmem:[#allocation2 + $0x20] sm:$0xff] }
   0x8   :  { %v218_v9 = vld [vmem:[#allocation2 + $0x18] sm:$0xff]  ;;  %v217_v10 = vld [vmem:[#allocation2 + $0x10] sm:$0xff]  ;;  %v216_v11 = vld [vmem:[#allocation2 + $0x8] sm:$0xff] }
   0x9   :  { %v215_v12 = vld [vmem:[#allocation2] sm:$0xff] }
   0xa   :  { %71 = vmatpush.bf16.msra.mxu0 %v213_v1  ;;  %v226_v14 = vld [vmem:[%s316_s2] ss:$0 sm:$0xff] }
   0xb   :  { %150 = vmatpush.bf16.msra.mxu1 %v221_v5  ;;  %v227_v21 = vld [vmem:[%s318_s4] ss:$0 sm:$0xff] }
   0xd   :  { %180 = vmatmul.msk.bf16.vlgmr.msra.gmra.mxu0 %vm60_vm0, %v39_v6 }
   0xf   :  { %151 = vmatpush.bf16.msra.mxu1 %v220_v7 }
  0x13   :  { %152 = vmatpush.bf16.msra.mxu1 %v219_v8 }
  0x17   :  { %153 = vmatpush.bf16.msra.mxu1 %v218_v9 }
  0x1b   :  { %154 = vmatpush.bf16.msra.mxu1 %v217_v10 }
  0x1f   :  { %155 = vmatpush.bf16.msra.mxu1 %v216_v11 }
  0x23   :  { %156 = vmatpush.bf16.msra.mxu1 %v215_v12 }
  0x8a   :  { %v73_v13 = vpop.f32.mrf.mxu0 }
  0x8b   :  { %v74_v15 = vadd.f32 %v226_v14, %v73_v13 }
  0x8d   :  { %v78_v18 = vmax.f32 %v74_v15, 0.0 }
  0x92   :  { %v75_v16 = vpop.f32.mrf.mxu0 }
  0x93   :  { %v76_v17 = vadd.f32 %v226_v14, %v75_v16 }
  0x95   :  { %v79_v19 = vmax.f32 %v76_v17, 0.0 }
  0x97   :  { %v80_v20 = vpack.c.bf16 %v79_v19, %v78_v18 }
  0x99   :  { %157 = vmatmul.bf16.vlgmr.msra.gmra.mxu1 %v80_v20 }
 0x116   :  { %v158_v22 = vpop.f32.mrf.mxu1 }
 0x117   :  { %v159_v23 = vadd.f32 %v227_v21, %v158_v22 }
 0x119   :  { %v163_v24 = vmax.f32 %v159_v23, 0.0 }
 0x11b   :  { %165 = vst [vmem:[%s319_s5] sm:$0xff] %v163_v24 }
 0x11e   :  { %v160_v25 = vpop.f32.mrf.mxu1 }
 0x11f   :  { %v161_v26 = vadd.f32 %v227_v21, %v160_v25 }
 0x121   :  { %v164_v27 = vmax.f32 %v161_v26, 0.0 }
 0x123   :  { %166 = vst [vmem:[%s319_s5 + $0x8] sm:$0xff] %v164_v27 }
 0x124   :  { %171 = vsyncpa [#allocation3], 1 }

</bundles_post_ra>
